<compile_context>
chip_gen: v6e
topology: v6e:2x2x1
jax: 0.10.0
libtpu: 0.0.40
codegen_flags: <defaults>
</compile_context>

<pallas_src>
import jax
import jax.numpy as jnp
import numpy as np
from jax.experimental import pallas as pl
from jax.experimental.pallas import tpu as pltpu

# ---------------- model hyper-parameters (small, consistent with module) ----
N_BATCH = 2
SEQ = 8
EMB = 32
HEADS = 4
HEAD_DIM = EMB // HEADS
FWD_EXP = 2
HIDDEN = FWD_EXP * EMB
LN_EPS = 1e-5
NEG_INF = -1e20

# f32 for tight parity at toy size; use jnp.bfloat16 on v6e/v7x in production.
MATMUL_DTYPE = jnp.float32


def _layernorm(x, gamma, beta):
    mean = jnp.mean(x, axis=-1, keepdims=True)
    var = jnp.mean(jnp.square(x - mean), axis=-1, keepdims=True)
    return (x - mean) * jax.lax.rsqrt(var + LN_EPS) * gamma + beta


def transformer_block_kernel(vkq_ref, bias_ref, wqkv_ref, wo_ref, w1_ref,
                             w2_ref, vecs_ref, out_ref, attn_ref):
    f32 = jnp.float32
    vkq = vkq_ref[0]               # (3, S, E): [value, key, query] for this batch
    bias = bias_ref[0]             # (S, S) additive mask (0 keep / -1e20 drop)
    vecs = vecs_ref[...]           # (8, 128) packed small params (one DMA)

    bo = vecs[0:1, 0:EMB]
    g1 = vecs[1:2, 0:EMB]
    be1 = vecs[2:3, 0:EMB]
    b1 = vecs[3:4, 0:HIDDEN]
    b2 = vecs[4:5, 0:EMB]
    g2 = vecs[5:6, 0:EMB]
    be2 = vecs[6:7, 0:EMB]

    # ---- fused V/K/Q projection: one 3-batched, lane-dense dot_general -----
    proj = jnp.einsum(
        'ste,sef->stf',
        vkq.astype(MATMUL_DTYPE), wqkv_ref[...].astype(MATMUL_DTYPE),
        preferred_element_type=f32)                   # (3, S, E)
    V = proj[0]                                       # (S, E)
    K = proj[1]                                       # (S, E)
    Q = proj[2]                                       # (S, E), pre-scaled by 1/sqrt(hd)

    # ---- attention: per-head (statically unrolled, static lane slices; ------
    # ---- last-dim contractions -> MXU-native, no in-kernel transposes) ------
    energies = []
    for h in range(HEADS):
        sl = slice(h * HEAD_DIM, (h + 1) * HEAD_DIM)
        e_h = jnp.einsum('qd,kd->qk',
                         Q[:, sl].astype(MATMUL_DTYPE),
                         K[:, sl].astype(MATMUL_DTYPE),
                         preferred_element_type=f32)  # (S, S)
        energies.append(e_h)
    energy = jnp.stack(energies, axis=0) + bias[None, :, :]   # (H, S, S)

    # batched, numerically-stable softmax over all heads at once
    m = jnp.max(energy, axis=-1, keepdims=True)
    p = jnp.exp(energy - m)
    denom = jnp.sum(p, axis=-1, keepdims=True)
    denom = jnp.maximum(denom, 1e-30)                 # guard all-masked rows
    r = pl.reciprocal(denom, approx=True)             # EUP reciprocal
    r = r * (2.0 - denom * r)                         # one Newton step -> f32 parity
    attn = p * r                                      # (H, S, S)
    attn_ref[0] = attn                                # single whole-block store

    # per-head context, then concatenate heads back along lanes -> (S, E)
    ctx_heads = []
    for h in range(HEADS):
        sl = slice(h * HEAD_DIM, (h + 1) * HEAD_DIM)
        ctx_heads.append(
            jnp.dot(attn[h].astype(MATMUL_DTYPE), V[:, sl].astype(MATMUL_DTYPE),
                    preferred_element_type=f32))      # (S, hd)
    ctx = jnp.concatenate(ctx_heads, axis=-1)         # (S, E)

    # ---- output projection: head-sum folded into ONE K=E contraction -------
    attn_out = jnp.dot(ctx.astype(MATMUL_DTYPE), wo_ref[...].astype(MATMUL_DTYPE),
                       preferred_element_type=f32) + bo        # (S, E)

    # ---- residual + norm1 (dropout = identity) -----------------------------
    q_in = vkq[2]                                     # original query stream
    x = _layernorm(attn_out + q_in, g1, be1)

    # ---- feed-forward: Linear -> ReLU -> Linear ----------------------------
    h1 = jnp.dot(x.astype(MATMUL_DTYPE), w1_ref[...].astype(MATMUL_DTYPE),
                 preferred_element_type=f32) + b1
    h1 = jnp.maximum(h1, 0.0)
    ff = jnp.dot(h1.astype(MATMUL_DTYPE), w2_ref[...].astype(MATMUL_DTYPE),
                 preferred_element_type=f32) + b2

    # ---- residual + norm2 (dropout = identity) -----------------------------
    out_ref[0] = _layernorm(ff + x, g2, be2)          # single store


@jax.jit
def transformer_block(value, key, query, mask, params):
    """TransformerBlock forward (eval mode).

    value/key/query: (N, S, E); mask: (N, 1, S, S), nonzero = keep.
    Returns out (N, S, E) and attention (N, H, S, S).
    """
    N, S, E = query.shape
    scale = jnp.float32(np.sqrt(HEAD_DIM))

    # single activation stack -- NO per-head replication (kernel broadcasts
    # nothing; the head axis lives only in static lane slices of the weights).
    vkq = jnp.stack([value, key, query], axis=1)                  # (N, 3, S, E)

    # additive attention bias per batch element: 0 = keep, -1e20 = drop.
    keep = (mask[:, 0] != 0)                                      # (N, S, S)
    bias = jnp.where(keep, 0.0, NEG_INF).astype(jnp.float32)      # (N, S, S)

    # stacked projection weights, 1/sqrt(head_dim) folded into Wq.
    w_qkv = jnp.stack([params["wv"], params["wk"], params["wq"] / scale],
                      axis=0)                                     # (3, E, E)

    # consolidated small vectors -> one (8, 128) VMEM tile, one DMA.
    vecs = jnp.zeros((8, 128), jnp.float32)
    vecs = vecs.at[0, :EMB].set(params["bo"][0])
    vecs = vecs.at[1, :EMB].set(params["g1"][0])
    vecs = vecs.at[2, :EMB].set(params["be1"][0])
    vecs = vecs.at[3, :HIDDEN].set(params["b1"][0])
    vecs = vecs.at[4, :EMB].set(params["b2"][0])
    vecs = vecs.at[5, :EMB].set(params["g2"][0])
    vecs = vecs.at[6, :EMB].set(params["be2"][0])

    inputs = [vkq, bias, w_qkv, params["wo"], params["w1"], params["w2"], vecs]

    in_specs = [
        pl.BlockSpec((1, 3, S, E), lambda b: (b, 0, 0, 0)),       # vkq (per batch)
        pl.BlockSpec((1, S, S), lambda b: (b, 0, 0)),             # bias (per batch)
        pl.BlockSpec((3, E, E), lambda b: (0, 0, 0)),             # w_qkv (shared)
        pl.BlockSpec((E, E), lambda b: (0, 0)),                   # wo
        pl.BlockSpec((E, HIDDEN), lambda b: (0, 0)),              # w1
        pl.BlockSpec((HIDDEN, E), lambda b: (0, 0)),              # w2
        pl.BlockSpec((8, 128), lambda b: (0, 0)),                 # packed vectors
    ]
    out_specs = [
        pl.BlockSpec((1, S, E), lambda b: (b, 0, 0)),             # block output
        pl.BlockSpec((1, HEADS, S, S), lambda b: (b, 0, 0, 0)),   # attention
    ]
    out_shape = [jax.ShapeDtypeStruct((N, S, E), jnp.float32),
                 jax.ShapeDtypeStruct((N, HEADS, S, S), jnp.float32)]

    flops_per_batch = 2 * (3 * S * E * E                         # fused V/K/Q proj
                           + 2 * HEADS * S * S * HEAD_DIM        # energy + attn@V
                           + S * E * E                           # output projection
                           + 2 * S * E * HIDDEN)                 # feed-forward
    cost = pl.CostEstimate(
        flops=int(N * flops_per_batch),
        transcendentals=int(N * (HEADS * S * S + 4 * S)),
        bytes_accessed=int(4 * (sum(int(np.prod(x.shape)) for x in inputs)
                                + N * S * E + N * HEADS * S * S)))

    out, attn = pl.pallas_call(
        transformer_block_kernel,
        out_shape=out_shape,
        grid_spec=pltpu.PrefetchScalarGridSpec(
            num_scalar_prefetch=0,
            grid=(N,),                      # one batch element per grid step
            in_specs=in_specs,
            out_specs=out_specs),
        compiler_params=pltpu.CompilerParams(
            dimension_semantics=("parallel",),       # megacore-shardable on v7x
            vmem_limit_bytes=32 * 1024 * 1024),
        cost_estimate=cost,
    )(*inputs)
    return out, attn


def reference(value, key, query, mask, params):
    """Pure-JAX re-implementation of the PyTorch forward (eval mode)."""
    V = value @ params["wv"]
    K = key @ params["wk"]
    Q = query @ params["wq"]
    N, S, E = Q.shape
    Vh = V.reshape(N, S, HEADS, HEAD_DIM)
    Kh = K.reshape(N, S, HEADS, HEAD_DIM)
    Qh = Q.reshape(N, S, HEADS, HEAD_DIM)
    energy = jnp.einsum("nqhd,nkhd->nhqk", Qh, Kh) / np.sqrt(HEAD_DIM)
    energy = jnp.where(mask == 0, NEG_INF, energy)
    attn = jax.nn.softmax(energy, axis=-1)
    out = jnp.einsum("nhqa,nahd->nqhd", attn, Vh).reshape(N, S, E)
    out = out @ params["wo"] + params["bo"]

    def ln(x, g, b):
        mean = jnp.mean(x, axis=-1, keepdims=True)
        var = jnp.mean(jnp.square(x - mean), axis=-1, keepdims=True)
        return (x - mean) * jax.lax.rsqrt(var + LN_EPS) * g + b

    x = ln(out + query, params["g1"], params["be1"])
    h1 = jnp.maximum(x @ params["w1"] + params["b1"], 0.0)
    ff = h1 @ params["w2"] + params["b2"]
    y = ln(ff + x, params["g2"], params["be2"])
    return y, attn


def init_params(key):
    keys = jax.random.split(key, 8)
    s_e = 1.0 / np.sqrt(EMB)
    s_h = 1.0 / np.sqrt(HIDDEN)
    return {
        "wv": jax.random.uniform(keys[0], (EMB, EMB), jnp.float32, -s_e, s_e),
        "wk": jax.random.uniform(keys[1], (EMB, EMB), jnp.float32, -s_e, s_e),
        "wq": jax.random.uniform(keys[2], (EMB, EMB), jnp.float32, -s_e, s_e),
        "wo": jax.random.uniform(keys[3], (EMB, EMB), jnp.float32, -s_e, s_e),
        "bo": jax.random.uniform(keys[4], (1, EMB), jnp.float32, -s_e, s_e),
        "g1": jnp.ones((1, EMB), jnp.float32),
        "be1": jnp.zeros((1, EMB), jnp.float32),
        "w1": jax.random.uniform(keys[5], (EMB, HIDDEN), jnp.float32, -s_e, s_e),
        "b1": jax.random.uniform(keys[6], (1, HIDDEN), jnp.float32, -s_e, s_e),
        "w2": jax.random.uniform(keys[7], (HIDDEN, EMB), jnp.float32, -s_h, s_h),
        "b2": jnp.zeros((1, EMB), jnp.float32),
        "g2": jnp.ones((1, EMB), jnp.float32),
        "be2": jnp.zeros((1, EMB), jnp.float32),
    }


if __name__ == "__main__":
    root = jax.random.PRNGKey(0)
    kp, kv, kk, kq = jax.random.split(root, 4)
    params = init_params(kp)

    value = jax.random.normal(kv, (N_BATCH, SEQ, EMB), jnp.float32)
    key_in = jax.random.normal(kk, (N_BATCH, SEQ, EMB), jnp.float32)
    query = jax.random.normal(kq, (N_BATCH, SEQ, EMB), jnp.float32)
    # causal mask, broadcast over heads (nonzero = keep)
    mask = jnp.broadcast_to(
        jnp.tril(jnp.ones((SEQ, SEQ), jnp.float32))[None, None],
        (N_BATCH, 1, SEQ, SEQ),
    )

    out, attn = transformer_block(value, key_in, query, mask, params)
    out = jax.block_until_ready(out)
    attn = jax.block_until_ready(attn)

    out_ref, attn_ref = reference(value, key_in, query, mask, params)
    np.testing.assert_allclose(np.asarray(out), np.asarray(out_ref),
                               rtol=1e-3, atol=1e-3)
    np.testing.assert_allclose(np.asarray(attn), np.asarray(attn_ref),
                               rtol=1e-3, atol=1e-3)

    print("KERNEL_OK")
</pallas_src>

<mosaic_0001>
module attributes {stable_mosaic.version = 11 : i64} {
  func.func @transformer_block_kernel(%arg0: i32, %arg1: memref<1x3x8x32xf32, #tpu.memory_space<vmem>>, %arg2: memref<1x8x8xf32, #tpu.memory_space<vmem>>, %arg3: memref<3x32x32xf32, #tpu.memory_space<vmem>>, %arg4: memref<32x32xf32, #tpu.memory_space<vmem>>, %arg5: memref<32x64xf32, #tpu.memory_space<vmem>>, %arg6: memref<64x32xf32, #tpu.memory_space<vmem>>, %arg7: memref<8x128xf32, #tpu.memory_space<vmem>>, %arg8: memref<1x8x32xf32, #tpu.memory_space<vmem>>, %arg9: memref<1x4x8x8xf32, #tpu.memory_space<vmem>>) attributes {dimension_semantics = [#tpu.dimension_semantics<parallel>], iteration_bounds = array<i64: 2>, scalar_prefetch = 0 : i64, scratch_operands = 0 : i64, tpu.core_type = #tpu.core_type<tc>, window_params = [{transform_indices = @transform_0, window_bounds = array<i64: 1, 3, 8, 32>}, {transform_indices = @transform_1, window_bounds = array<i64: 1, 8, 8>}, {pipeline_mode = #tpu.pipeline_mode<synchronous>, transform_indices = @transform_2, window_bounds = array<i64: 3, 32, 32>}, {pipeline_mode = #tpu.pipeline_mode<synchronous>, transform_indices = @transform_3, window_bounds = array<i64: 32, 32>}, {pipeline_mode = #tpu.pipeline_mode<synchronous>, transform_indices = @transform_4, window_bounds = array<i64: 32, 64>}, {pipeline_mode = #tpu.pipeline_mode<synchronous>, transform_indices = @transform_5, window_bounds = array<i64: 64, 32>}, {pipeline_mode = #tpu.pipeline_mode<synchronous>, transform_indices = @transform_6, window_bounds = array<i64: 8, 128>}, {transform_indices = @transform_7, window_bounds = array<i64: 1, 8, 32>}, {transform_indices = @transform_8, window_bounds = array<i64: 1, 4, 8, 8>}]} {
    %c0 = arith.constant 0 : index
    %c0_0 = arith.constant 0 : index
    %c0_1 = arith.constant 0 : index
    %c0_2 = arith.constant 0 : index
    %0 = vector.load %arg1[%c0, %c0_0, %c0_1, %c0_2] : memref<1x3x8x32xf32, #tpu.memory_space<vmem>>, vector<1x3x8x32xf32>
    %1 = vector.shape_cast %0 : vector<1x3x8x32xf32> to vector<3x8x32xf32>
    %c0_3 = arith.constant 0 : index
    %c0_4 = arith.constant 0 : index
    %c0_5 = arith.constant 0 : index
    %2 = vector.load %arg2[%c0_3, %c0_4, %c0_5] : memref<1x8x8xf32, #tpu.memory_space<vmem>>, vector<1x8x8xf32>
    %3 = vector.shape_cast %2 : vector<1x8x8xf32> to vector<8x8xf32>
    %c0_6 = arith.constant 0 : index
    %c0_7 = arith.constant 0 : index
    %4 = vector.load %arg7[%c0_6, %c0_7] : memref<8x128xf32, #tpu.memory_space<vmem>>, vector<8x128xf32>
    %5 = vector.extract_strided_slice %4 {offsets = [0, 0], sizes = [1, 32], strides = [1, 1]} : vector<8x128xf32> to vector<1x32xf32>
    %6 = vector.extract_strided_slice %4 {offsets = [1, 0], sizes = [1, 32], strides = [1, 1]} : vector<8x128xf32> to vector<1x32xf32>
    %7 = vector.extract_strided_slice %4 {offsets = [2, 0], sizes = [1, 32], strides = [1, 1]} : vector<8x128xf32> to vector<1x32xf32>
    %8 = vector.extract_strided_slice %4 {offsets = [3, 0], sizes = [1, 64], strides = [1, 1]} : vector<8x128xf32> to vector<1x64xf32>
    %9 = vector.extract_strided_slice %4 {offsets = [4, 0], sizes = [1, 32], strides = [1, 1]} : vector<8x128xf32> to vector<1x32xf32>
    %10 = vector.extract_strided_slice %4 {offsets = [5, 0], sizes = [1, 32], strides = [1, 1]} : vector<8x128xf32> to vector<1x32xf32>
    %11 = vector.extract_strided_slice %4 {offsets = [6, 0], sizes = [1, 32], strides = [1, 1]} : vector<8x128xf32> to vector<1x32xf32>
    %c0_8 = arith.constant 0 : index
    %c0_9 = arith.constant 0 : index
    %c0_10 = arith.constant 0 : index
    %12 = vector.load %arg3[%c0_8, %c0_9, %c0_10] : memref<3x32x32xf32, #tpu.memory_space<vmem>>, vector<3x32x32xf32>
    "tpu.trace_start"() <{level = 10 : i32, message = "ste,sef->stf"}> : () -> ()
    %cst = arith.constant dense<0.000000e+00> : vector<3x8x32xf32>
    %13 = tpu.matmul %1, %12, %cst {dimension_numbers = #tpu.dot_dimension_numbers<[2], [1], [1], [2], [0, 0, 0, 1, 1, 2], [0], [0]>} : vector<3x8x32xf32>, vector<3x32x32xf32>, vector<3x8x32xf32> -> vector<3x8x32xf32>
    "tpu.trace_stop"() : () -> ()
    %14 = vector.extract_strided_slice %13 {offsets = [0, 0, 0], sizes = [1, 8, 32], strides = [1, 1, 1]} : vector<3x8x32xf32> to vector<1x8x32xf32>
    %15 = vector.shape_cast %14 : vector<1x8x32xf32> to vector<8x32xf32>
    %16 = vector.extract_strided_slice %13 {offsets = [1, 0, 0], sizes = [1, 8, 32], strides = [1, 1, 1]} : vector<3x8x32xf32> to vector<1x8x32xf32>
    %17 = vector.shape_cast %16 : vector<1x8x32xf32> to vector<8x32xf32>
    %18 = vector.extract_strided_slice %13 {offsets = [2, 0, 0], sizes = [1, 8, 32], strides = [1, 1, 1]} : vector<3x8x32xf32> to vector<1x8x32xf32>
    %19 = vector.shape_cast %18 : vector<1x8x32xf32> to vector<8x32xf32>
    %20 = vector.extract_strided_slice %19 {offsets = [0, 0], sizes = [8, 8], strides = [1, 1]} : vector<8x32xf32> to vector<8x8xf32>
    %21 = vector.extract_strided_slice %17 {offsets = [0, 0], sizes = [8, 8], strides = [1, 1]} : vector<8x32xf32> to vector<8x8xf32>
    "tpu.trace_start"() <{level = 10 : i32, message = "qd,kd->qk"}> : () -> ()
    %cst_11 = arith.constant dense<0.000000e+00> : vector<8x8xf32>
    %22 = tpu.matmul %20, %21, %cst_11 {dimension_numbers = #tpu.dot_dimension_numbers<[1], [1], [0], [0], [0, 0, 1, 0], [], []>} : vector<8x8xf32>, vector<8x8xf32>, vector<8x8xf32> -> vector<8x8xf32>
    "tpu.trace_stop"() : () -> ()
    %23 = vector.extract_strided_slice %19 {offsets = [0, 8], sizes = [8, 8], strides = [1, 1]} : vector<8x32xf32> to vector<8x8xf32>
    %24 = vector.extract_strided_slice %17 {offsets = [0, 8], sizes = [8, 8], strides = [1, 1]} : vector<8x32xf32> to vector<8x8xf32>
    "tpu.trace_start"() <{level = 10 : i32, message = "qd,kd->qk"}> : () -> ()
    %cst_12 = arith.constant dense<0.000000e+00> : vector<8x8xf32>
    %25 = tpu.matmul %23, %24, %cst_12 {dimension_numbers = #tpu.dot_dimension_numbers<[1], [1], [0], [0], [0, 0, 1, 0], [], []>} : vector<8x8xf32>, vector<8x8xf32>, vector<8x8xf32> -> vector<8x8xf32>
    "tpu.trace_stop"() : () -> ()
    %26 = vector.extract_strided_slice %19 {offsets = [0, 16], sizes = [8, 8], strides = [1, 1]} : vector<8x32xf32> to vector<8x8xf32>
    %27 = vector.extract_strided_slice %17 {offsets = [0, 16], sizes = [8, 8], strides = [1, 1]} : vector<8x32xf32> to vector<8x8xf32>
    "tpu.trace_start"() <{level = 10 : i32, message = "qd,kd->qk"}> : () -> ()
    %cst_13 = arith.constant dense<0.000000e+00> : vector<8x8xf32>
    %28 = tpu.matmul %26, %27, %cst_13 {dimension_numbers = #tpu.dot_dimension_numbers<[1], [1], [0], [0], [0, 0, 1, 0], [], []>} : vector<8x8xf32>, vector<8x8xf32>, vector<8x8xf32> -> vector<8x8xf32>
    "tpu.trace_stop"() : () -> ()
    %29 = vector.extract_strided_slice %19 {offsets = [0, 24], sizes = [8, 8], strides = [1, 1]} : vector<8x32xf32> to vector<8x8xf32>
    %30 = vector.extract_strided_slice %17 {offsets = [0, 24], sizes = [8, 8], strides = [1, 1]} : vector<8x32xf32> to vector<8x8xf32>
    "tpu.trace_start"() <{level = 10 : i32, message = "qd,kd->qk"}> : () -> ()
    %cst_14 = arith.constant dense<0.000000e+00> : vector<8x8xf32>
    %31 = tpu.matmul %29, %30, %cst_14 {dimension_numbers = #tpu.dot_dimension_numbers<[1], [1], [0], [0], [0, 0, 1, 0], [], []>} : vector<8x8xf32>, vector<8x8xf32>, vector<8x8xf32> -> vector<8x8xf32>
    "tpu.trace_stop"() : () -> ()
    %32 = vector.shape_cast %22 : vector<8x8xf32> to vector<1x8x8xf32>
    %33 = vector.shape_cast %25 : vector<8x8xf32> to vector<1x8x8xf32>
    %34 = vector.shape_cast %28 : vector<8x8xf32> to vector<1x8x8xf32>
    %35 = vector.shape_cast %31 : vector<8x8xf32> to vector<1x8x8xf32>
    %36 = tpu.concatenate %32, %33, %34, %35 in 0 : vector<1x8x8xf32>, vector<1x8x8xf32>, vector<1x8x8xf32>, vector<1x8x8xf32> -> vector<4x8x8xf32>
    %37 = vector.shape_cast %3 : vector<8x8xf32> to vector<1x8x8xf32>
    %38 = vector.broadcast %37 : vector<1x8x8xf32> to vector<4x8x8xf32>
    %39 = arith.addf %36, %38 : vector<4x8x8xf32>
    %cst_15 = arith.constant dense<0xFF800000> : vector<4x8xf32>
    %40 = vector.multi_reduction <maximumf>, %39, %cst_15 [2] : vector<4x8x8xf32> to vector<4x8xf32>
    %41 = vector.shape_cast %40 : vector<4x8xf32> to vector<4x8x1xf32>
    %42 = vector.broadcast %41 : vector<4x8x1xf32> to vector<4x8x8xf32>
    %43 = arith.subf %39, %42 : vector<4x8x8xf32>
    %44 = math.exp %43 : vector<4x8x8xf32>
    %cst_16 = arith.constant dense<0.000000e+00> : vector<4x8xf32>
    %45 = vector.multi_reduction <add>, %44, %cst_16 [2] : vector<4x8x8xf32> to vector<4x8xf32>
    %46 = vector.shape_cast %45 : vector<4x8xf32> to vector<4x8x1xf32>
    %cst_17 = arith.constant 1.000000e-30 : f32
    %47 = vector.broadcast %cst_17 : f32 to vector<4x8x1xf32>
    %48 = arith.maximumf %46, %47 : vector<4x8x1xf32>
    %49 = tpu.reciprocal %48 {approx = true} : vector<4x8x1xf32> -> vector<4x8x1xf32>
    %50 = arith.mulf %48, %49 : vector<4x8x1xf32>
    %cst_18 = arith.constant 2.000000e+00 : f32
    %51 = vector.broadcast %cst_18 : f32 to vector<4x8x1xf32>
    %52 = arith.subf %51, %50 : vector<4x8x1xf32>
    %53 = arith.mulf %49, %52 : vector<4x8x1xf32>
    %54 = vector.broadcast %53 : vector<4x8x1xf32> to vector<4x8x8xf32>
    %55 = arith.mulf %44, %54 : vector<4x8x8xf32>
    %c0_19 = arith.constant 0 : index
    %c0_20 = arith.constant 0 : index
    %c0_21 = arith.constant 0 : index
    %c0_22 = arith.constant 0 : index
    %56 = vector.load %arg9[%c0_19, %c0_20, %c0_21, %c0_22] : memref<1x4x8x8xf32, #tpu.memory_space<vmem>>, vector<1x4x8x8xf32>
    %57 = vector.shape_cast %56 : vector<1x4x8x8xf32> to vector<4x8x8xf32>
    %58 = vector.shape_cast %55 : vector<4x8x8xf32> to vector<1x4x8x8xf32>
    tpu.vector_store %arg9[%c0_19, %c0_20, %c0_21, %c0_22], %58 {strides = array<i32>} : memref<1x4x8x8xf32, #tpu.memory_space<vmem>>, vector<1x4x8x8xf32>,
    %59 = vector.extract_strided_slice %55 {offsets = [0, 0, 0], sizes = [1, 8, 8], strides = [1, 1, 1]} : vector<4x8x8xf32> to vector<1x8x8xf32>
    %60 = vector.shape_cast %59 : vector<1x8x8xf32> to vector<8x8xf32>
    %61 = vector.extract_strided_slice %15 {offsets = [0, 0], sizes = [8, 8], strides = [1, 1]} : vector<8x32xf32> to vector<8x8xf32>
    %cst_23 = arith.constant dense<0.000000e+00> : vector<8x8xf32>
    %62 = tpu.matmul %60, %61, %cst_23 {dimension_numbers = #tpu.dot_dimension_numbers<[1], [0], [0], [1], [0, 0, 1, 1], [], []>} : vector<8x8xf32>, vector<8x8xf32>, vector<8x8xf32> -> vector<8x8xf32>
    %63 = vector.extract_strided_slice %55 {offsets = [1, 0, 0], sizes = [1, 8, 8], strides = [1, 1, 1]} : vector<4x8x8xf32> to vector<1x8x8xf32>
    %64 = vector.shape_cast %63 : vector<1x8x8xf32> to vector<8x8xf32>
    %65 = vector.extract_strided_slice %15 {offsets = [0, 8], sizes = [8, 8], strides = [1, 1]} : vector<8x32xf32> to vector<8x8xf32>
    %cst_24 = arith.constant dense<0.000000e+00> : vector<8x8xf32>
    %66 = tpu.matmul %64, %65, %cst_24 {dimension_numbers = #tpu.dot_dimension_numbers<[1], [0], [0], [1], [0, 0, 1, 1], [], []>} : vector<8x8xf32>, vector<8x8xf32>, vector<8x8xf32> -> vector<8x8xf32>
    %67 = vector.extract_strided_slice %55 {offsets = [2, 0, 0], sizes = [1, 8, 8], strides = [1, 1, 1]} : vector<4x8x8xf32> to vector<1x8x8xf32>
    %68 = vector.shape_cast %67 : vector<1x8x8xf32> to vector<8x8xf32>
    %69 = vector.extract_strided_slice %15 {offsets = [0, 16], sizes = [8, 8], strides = [1, 1]} : vector<8x32xf32> to vector<8x8xf32>
    %cst_25 = arith.constant dense<0.000000e+00> : vector<8x8xf32>
    %70 = tpu.matmul %68, %69, %cst_25 {dimension_numbers = #tpu.dot_dimension_numbers<[1], [0], [0], [1], [0, 0, 1, 1], [], []>} : vector<8x8xf32>, vector<8x8xf32>, vector<8x8xf32> -> vector<8x8xf32>
    %71 = vector.extract_strided_slice %55 {offsets = [3, 0, 0], sizes = [1, 8, 8], strides = [1, 1, 1]} : vector<4x8x8xf32> to vector<1x8x8xf32>
    %72 = vector.shape_cast %71 : vector<1x8x8xf32> to vector<8x8xf32>
    %73 = vector.extract_strided_slice %15 {offsets = [0, 24], sizes = [8, 8], strides = [1, 1]} : vector<8x32xf32> to vector<8x8xf32>
    %cst_26 = arith.constant dense<0.000000e+00> : vector<8x8xf32>
    %74 = tpu.matmul %72, %73, %cst_26 {dimension_numbers = #tpu.dot_dimension_numbers<[1], [0], [0], [1], [0, 0, 1, 1], [], []>} : vector<8x8xf32>, vector<8x8xf32>, vector<8x8xf32> -> vector<8x8xf32>
    %75 = tpu.concatenate %62, %66, %70, %74 in 1 : vector<8x8xf32>, vector<8x8xf32>, vector<8x8xf32>, vector<8x8xf32> -> vector<8x32xf32>
    %c0_27 = arith.constant 0 : index
    %c0_28 = arith.constant 0 : index
    %76 = vector.load %arg4[%c0_27, %c0_28] : memref<32x32xf32, #tpu.memory_space<vmem>>, vector<32x32xf32>
    %cst_29 = arith.constant dense<0.000000e+00> : vector<8x32xf32>
    %77 = tpu.matmul %75, %76, %cst_29 {dimension_numbers = #tpu.dot_dimension_numbers<[1], [0], [0], [1], [0, 0, 1, 1], [], []>} : vector<8x32xf32>, vector<32x32xf32>, vector<8x32xf32> -> vector<8x32xf32>
    %78 = vector.broadcast %5 : vector<1x32xf32> to vector<8x32xf32>
    %79 = arith.addf %77, %78 : vector<8x32xf32>
    %80 = vector.extract_strided_slice %1 {offsets = [2, 0, 0], sizes = [1, 8, 32], strides = [1, 1, 1]} : vector<3x8x32xf32> to vector<1x8x32xf32>
    %81 = vector.shape_cast %80 : vector<1x8x32xf32> to vector<8x32xf32>
    %82 = arith.addf %79, %81 : vector<8x32xf32>
    %cst_30 = arith.constant dense<0.000000e+00> : vector<8xf32>
    %83 = vector.multi_reduction <add>, %82, %cst_30 [1] : vector<8x32xf32> to vector<8xf32>
    %84 = vector.shape_cast %83 : vector<8xf32> to vector<8x1xf32>
    %cst_31 = arith.constant 3.200000e+01 : f32
    %85 = vector.broadcast %cst_31 : f32 to vector<8x1xf32>
    %86 = arith.divf %84, %85 : vector<8x1xf32>
    %87 = vector.broadcast %86 : vector<8x1xf32> to vector<8x32xf32>
    %88 = arith.subf %82, %87 : vector<8x32xf32>
    %89 = arith.mulf %88, %88 : vector<8x32xf32>
    %cst_32 = arith.constant dense<0.000000e+00> : vector<8xf32>
    %90 = vector.multi_reduction <add>, %89, %cst_32 [1] : vector<8x32xf32> to vector<8xf32>
    %91 = vector.shape_cast %90 : vector<8xf32> to vector<8x1xf32>
    %cst_33 = arith.constant 3.200000e+01 : f32
    %92 = vector.broadcast %cst_33 : f32 to vector<8x1xf32>
    %93 = arith.divf %91, %92 : vector<8x1xf32>
    %94 = vector.broadcast %86 : vector<8x1xf32> to vector<8x32xf32>
    %95 = arith.subf %82, %94 : vector<8x32xf32>
    %cst_34 = arith.constant 9.99999974E-6 : f32
    %96 = vector.broadcast %cst_34 : f32 to vector<8x1xf32>
    %97 = arith.addf %93, %96 : vector<8x1xf32>
    %98 = math.rsqrt %97 : vector<8x1xf32>
    %99 = vector.broadcast %98 : vector<8x1xf32> to vector<8x32xf32>
    %100 = arith.mulf %95, %99 : vector<8x32xf32>
    %101 = vector.broadcast %6 : vector<1x32xf32> to vector<8x32xf32>
    %102 = arith.mulf %100, %101 : vector<8x32xf32>
    %103 = vector.broadcast %7 : vector<1x32xf32> to vector<8x32xf32>
    %104 = arith.addf %102, %103 : vector<8x32xf32>
    %c0_35 = arith.constant 0 : index
    %c0_36 = arith.constant 0 : index
    %105 = vector.load %arg5[%c0_35, %c0_36] : memref<32x64xf32, #tpu.memory_space<vmem>>, vector<32x64xf32>
    %cst_37 = arith.constant dense<0.000000e+00> : vector<8x64xf32>
    %106 = tpu.matmul %104, %105, %cst_37 {dimension_numbers = #tpu.dot_dimension_numbers<[1], [0], [0], [1], [0, 0, 1, 1], [], []>} : vector<8x32xf32>, vector<32x64xf32>, vector<8x64xf32> -> vector<8x64xf32>
    %107 = vector.broadcast %8 : vector<1x64xf32> to vector<8x64xf32>
    %108 = arith.addf %106, %107 : vector<8x64xf32>
    %cst_38 = arith.constant 0.000000e+00 : f32
    %109 = vector.broadcast %cst_38 : f32 to vector<8x64xf32>
    %110 = arith.maximumf %108, %109 : vector<8x64xf32>
    %c0_39 = arith.constant 0 : index
    %c0_40 = arith.constant 0 : index
    %111 = vector.load %arg6[%c0_39, %c0_40] : memref<64x32xf32, #tpu.memory_space<vmem>>, vector<64x32xf32>
    %cst_41 = arith.constant dense<0.000000e+00> : vector<8x32xf32>
    %112 = tpu.matmul %110, %111, %cst_41 {dimension_numbers = #tpu.dot_dimension_numbers<[1], [0], [0], [1], [0, 0, 1, 1], [], []>} : vector<8x64xf32>, vector<64x32xf32>, vector<8x32xf32> -> vector<8x32xf32>
    %113 = vector.broadcast %9 : vector<1x32xf32> to vector<8x32xf32>
    %114 = arith.addf %112, %113 : vector<8x32xf32>
    %115 = arith.addf %114, %104 : vector<8x32xf32>
    %cst_42 = arith.constant dense<0.000000e+00> : vector<8xf32>
    %116 = vector.multi_reduction <add>, %115, %cst_42 [1] : vector<8x32xf32> to vector<8xf32>
    %117 = vector.shape_cast %116 : vector<8xf32> to vector<8x1xf32>
    %cst_43 = arith.constant 3.200000e+01 : f32
    %118 = vector.broadcast %cst_43 : f32 to vector<8x1xf32>
    %119 = arith.divf %117, %118 : vector<8x1xf32>
    %120 = vector.broadcast %119 : vector<8x1xf32> to vector<8x32xf32>
    %121 = arith.subf %115, %120 : vector<8x32xf32>
    %122 = arith.mulf %121, %121 : vector<8x32xf32>
    %cst_44 = arith.constant dense<0.000000e+00> : vector<8xf32>
    %123 = vector.multi_reduction <add>, %122, %cst_44 [1] : vector<8x32xf32> to vector<8xf32>
    %124 = vector.shape_cast %123 : vector<8xf32> to vector<8x1xf32>
    %cst_45 = arith.constant 3.200000e+01 : f32
    %125 = vector.broadcast %cst_45 : f32 to vector<8x1xf32>
    %126 = arith.divf %124, %125 : vector<8x1xf32>
    %127 = vector.broadcast %119 : vector<8x1xf32> to vector<8x32xf32>
    %128 = arith.subf %115, %127 : vector<8x32xf32>
    %cst_46 = arith.constant 9.99999974E-6 : f32
    %129 = vector.broadcast %cst_46 : f32 to vector<8x1xf32>
    %130 = arith.addf %126, %129 : vector<8x1xf32>
    %131 = math.rsqrt %130 : vector<8x1xf32>
    %132 = vector.broadcast %131 : vector<8x1xf32> to vector<8x32xf32>
    %133 = arith.mulf %128, %132 : vector<8x32xf32>
    %134 = vector.broadcast %10 : vector<1x32xf32> to vector<8x32xf32>
    %135 = arith.mulf %133, %134 : vector<8x32xf32>
    %136 = vector.broadcast %11 : vector<1x32xf32> to vector<8x32xf32>
    %137 = arith.addf %135, %136 : vector<8x32xf32>
    %c0_47 = arith.constant 0 : index
    %c0_48 = arith.constant 0 : index
    %c0_49 = arith.constant 0 : index
    %138 = vector.load %arg8[%c0_47, %c0_48, %c0_49] : memref<1x8x32xf32, #tpu.memory_space<vmem>>, vector<1x8x32xf32>
    %139 = vector.shape_cast %138 : vector<1x8x32xf32> to vector<8x32xf32>
    %140 = vector.shape_cast %137 : vector<8x32xf32> to vector<1x8x32xf32>
    tpu.vector_store %arg8[%c0_47, %c0_48, %c0_49], %140 {strides = array<i32>} : memref<1x8x32xf32, #tpu.memory_space<vmem>>, vector<1x8x32xf32>,
    return
  }
  func.func @transform_0(%arg0: i32) -> (i32, i32, i32, i32) {
    %c0_i32 = arith.constant 0 : i32
    %c0_i32_0 = arith.constant 0 : i32
    %c0_i32_1 = arith.constant 0 : i32
    %c0_i32_2 = arith.constant 0 : i32
    return %arg0, %c0_i32, %c0_i32_0, %c0_i32_1 : i32, i32, i32, i32
  }
  func.func @transform_1(%arg0: i32) -> (i32, i32, i32) {
    %c0_i32 = arith.constant 0 : i32
    %c0_i32_0 = arith.constant 0 : i32
    %c0_i32_1 = arith.constant 0 : i32
    return %arg0, %c0_i32, %c0_i32_0 : i32, i32, i32
  }
  func.func @transform_2(%arg0: i32) -> (i32, i32, i32) {
    %c0_i32 = arith.constant 0 : i32
    %c0_i32_0 = arith.constant 0 : i32
    %c0_i32_1 = arith.constant 0 : i32
    %c0_i32_2 = arith.constant 0 : i32
    return %c0_i32, %c0_i32_0, %c0_i32_1 : i32, i32, i32
  }
  func.func @transform_3(%arg0: i32) -> (i32, i32) {
    %c0_i32 = arith.constant 0 : i32
    %c0_i32_0 = arith.constant 0 : i32
    %c0_i32_1 = arith.constant 0 : i32
    return %c0_i32, %c0_i32_0 : i32, i32
  }
  func.func @transform_4(%arg0: i32) -> (i32, i32) {
    %c0_i32 = arith.constant 0 : i32
    %c0_i32_0 = arith.constant 0 : i32
    %c0_i32_1 = arith.constant 0 : i32
    return %c0_i32, %c0_i32_0 : i32, i32
  }
  func.func @transform_5(%arg0: i32) -> (i32, i32) {
    %c0_i32 = arith.constant 0 : i32
    %c0_i32_0 = arith.constant 0 : i32
    %c0_i32_1 = arith.constant 0 : i32
    return %c0_i32, %c0_i32_0 : i32, i32
  }
  func.func @transform_6(%arg0: i32) -> (i32, i32) {
    %c0_i32 = arith.constant 0 : i32
    %c0_i32_0 = arith.constant 0 : i32
    %c0_i32_1 = arith.constant 0 : i32
    return %c0_i32, %c0_i32_0 : i32, i32
  }
  func.func @transform_7(%arg0: i32) -> (i32, i32, i32) {
    %c0_i32 = arith.constant 0 : i32
    %c0_i32_0 = arith.constant 0 : i32
    %c0_i32_1 = arith.constant 0 : i32
    return %arg0, %c0_i32, %c0_i32_0 : i32, i32, i32
  }
  func.func @transform_8(%arg0: i32) -> (i32, i32, i32, i32) {
    %c0_i32 = arith.constant 0 : i32
    %c0_i32_0 = arith.constant 0 : i32
    %c0_i32_1 = arith.constant 0 : i32
    %c0_i32_2 = arith.constant 0 : i32
    return %arg0, %c0_i32, %c0_i32_0, %c0_i32_1 : i32, i32, i32, i32
  }
}

</mosaic_0001>

<bundles_post_ra>
// kernel: transformer_block.1
= control target key start
LH: loop header
LB: loop body
LE: loop exit
PB: predicated region body
PF: predicated region fallthrough
CT: control target
= control target key end

     0   :  { %14 = vsyncpa [#allocation3], 0  ;;  %s2486_s0 = inlined_call_operand.vmem [shape: f32[2,3,8,32], index: 0, kind: input, shape index: {}]   ;;  %s2487_s1 = inlined_call_operand.vmem [shape: f32[2,8,8], index: 1, kind: input, shape index: {}]   ;;  %s2488_s2 = inlined_call_operand.vmem [shape: f32[3,32,32], index: 2, kind: input, shape index: {}]   ;;  %s2489_s3 = inlined_call_operand.vmem [shape: f32[32,32], index: 3, kind: input, shape index: {}]   ;;  %s2490_s4 = inlined_call_operand.vmem [shape: f32[32,64], index: 4, kind: input, shape index: {}]   ;;  %s2491_s5 = inlined_call_operand.vmem [shape: f32[64,32], index: 5, kind: input, shape index: {}]   ;;  %s2492_s6 = inlined_call_operand.vmem [shape: f32[8,128], index: 6, kind: input, shape index: {}]   ;;  %s2493_s7 = inlined_call_operand.hbm [shape: f32[2,8,32], index: 7, kind: output, shape index: {0}]   ;;  %s2494_s8 = inlined_call_operand.hbm [shape: f32[2,4,8,8], index: 8, kind: output, shape index: {1}]  }
   0x1   :  { %16 = vsyncpa [#allocation3 + $0x1], 0 }
   0x2   :  { %17 = vsyncpa [#allocation5], 0 }
   0x3   :  { %19 = vsyncpa [#allocation5 + $0x1], 0  ;;  %s2124_s27 = smov 0   ;;  %s2126_s28 = smov 0  }
   0x4   :  { %s2128_s29 = smov 0   ;;  %s2130_s30 = smov 0  }
   0x5 LB: > { %s2145_s9 = sadd.s32 4294967295, %s2066_s30   ;;  %s1704_s10 = sadd.s32 4294967294, %s2066_s30   ;;  %s2066_s30 = sphi %s2130_s30, %s2501_s30   ;;  %s2062_s29 = sphi %s2128_s29, %s2500_s29   ;;  %s2058_s28 = sphi %s2126_s28, %s2499_s28   ;;  %s2054_s27 = sphi %s2124_s27, %s2498_s27  }
   0x6   : > { %s2149_s11 = sadd.s32 1, %s2066_s30   ;;  %s189_s12 = sadd.s32 1, %s2062_s29 }
   0x7   : > { %s186_s13 = ssub.s32 %s2066_s30, %s2149_s11  ;;  %p199_p0 = scmp.ne.s32.totalorder %s2062_s29, %s2058_s28 }
   0x8   : > { %p187_p1 = scmp.eq.s32.totalorder %s186_s13, 0  ;;  %p200_p2 = scmp.eq.s32.totalorder %s2145_s9, 1 }
   0x9   : > { %p205_p3 = scmp.ne.s32.totalorder %s2058_s28, %s2054_s27  ;;  %p206_p4 = scmp.eq.s32.totalorder %s1704_s10, 1 }
   0xa   : > { %s2160_s14 = scalar_select %p187_p1, %s2062_s29, %s189_s12  }
   0xb   : > { %p2162_p5 = por %p200_p2, %p199_p0  ;;  %p2166_p6 = por %p206_p4, %p205_p3 }
   0xc   : > { %p1707_p7 = scmp.ge.s32.totalorder %s2066_s30, 1  ;;  %p280_p8 = scmp.lt.s32.totalorder %s2066_s30, 3 }
   0xe   : > { %p281_p9 = pnand %p1707_p7, %p280_p8 }
   0xf   : > { %p323_p10 = scmp.lt.s32.totalorder (!%p281_p9), %s2145_s9, 1  ;;  %s2070_s22 = smov (!%p281_p9), 112  }
  0x10   : > { %284 = sbr.rel (%p281_p9) target bundleno = 2403 (0x963), region = 48  ;;  %s2072_s24 = smov (!%p281_p9), 104  }
  0x11   : > { %s2073_s10 = smov (!%p281_p9), 8   ;;  %s1737_s26 = sshll.u32 (!%p281_p9), %s2145_s9, 9 }
  0x12   : > { %s2420_s18 = scalar_lea.hbm (!%p281_p9), %s2494_s8, %s1737_s26 }
  0x15   : > { %v340_v0 = vld [vmem:[%s2488_s2 + $0x18] sm:$0xff]  ;;  %v2068_v1 = vmov 0.0   ;;  %v339_v2 = vld [vmem:[%s2488_s2 + $0x10] sm:$0xff]  ;;  %vm2069_vm0 = vmmov 0   ;;  %s2183_s21 = scalar_select %p323_p10, %s2145_s9, 1  ;;  %v338_v5 = vld [vmem:[%s2488_s2 + $0x8] sm:$0xff] }
  0x16   : > { %1788 = vmatprep.subr.mxu1 %v2068_v1  ;;  %1796 = vmatprep.mubr.msk.f32.mxu1 %vm2069_vm0, %v2068_v1  ;;  %v348_v3 = vld [vmem:[%s2488_s2 + $0x58] sm:$0xff]  ;;  %v347_v4 = vld [vmem:[%s2488_s2 + $0x50] sm:$0xff]  ;;  %v346_v6 = vld [vmem:[%s2488_s2 + $0x48] sm:$0xff]  ;;  %vm349_vm1 = vcmask 261120   ;;  %vm569_vm2 = vcmask 64512   ;;  %vm1263_vm3 = vcmask 130048  }
  0x17   : > { %1789 = vmatpush3.msra.mxu1 %v340_v0  ;;  %1810 = vmatprep.subr.mxu0 %v2068_v1  ;;  %s1902_s12 = smul.u32 24, %s2183_s21  ;;  %v337_v7 = vld [vmem:[%s2488_s2] sm:$0xff]  ;;  %v344_v9 = vld [vmem:[%s2488_s2 + $0x38] sm:$0xff]  ;;  %v343_v11 = vld [vmem:[%s2488_s2 + $0x30] sm:$0xff]  ;;  %s1711_s25 = sshll.u32 %s2183_s21, 3  ;;  %vm1265_vm4 = vcmask 195584  }
  0x18   : > { %1790 = vmatprep.subr.mxu1 %v2068_v1  ;;  %1811 = vmatpush3.msra.mxu0 %v348_v3  ;;  %v345_v10 = vld [vmem:[%s2488_s2 + $0x40] sm:$0xff]  ;;  %v342_v13 = vld [vmem:[%s2488_s2 + $0x28] sm:$0xff]  ;;  %s2295_s21 = sand.u32 1, %s2058_s28   ;;  %vm1467_vm5 = vcmask 523264  }
  0x19   : > { %1791 = vmatpush3.msra.mxu1 %v339_v2  ;;  %1812 = vmatprep.subr.mxu0 %v2068_v1  ;;  %s327_s23 = scalar_lea.vmem %s2486_s0, %s1902_s12  ;;  %v341_v14 = vld [vmem:[%s2488_s2 + $0x20] sm:$0xff]  ;;  %s331_s12 = scalar_lea.vmem %s2487_s1, %s1711_s25 }
  0x1a   : > { %1792 = vmatprep.subr.mxu1 %v2068_v1  ;;  %1813 = vmatpush3.msra.mxu0 %v347_v4  ;;  %v332_v8 = vld [vmem:[%s327_s23] sm:$0xff]  ;;  %v2224_v12 = vld [vmem:[%s327_s23 + $0x10] sm:$0xff]  ;;  %v333_v15 = vld [vmem:[%s327_s23 + $0x8] sm:$0xff]  ;;  %s2071_s23 = smov 120   ;;  %s1709_s13 = sshll.u32 %s2295_s21, 5 }
  0x1b   : > { %1793 = vmatpush3.msra.mxu1 %v338_v5  ;;  %1814 = vmatprep.subr.mxu0 %v2068_v1  ;;  %v335_v28 = vld [vmem:[%s331_s12] sm:$0xff]  ;;  %s2299_s17 = scalar_lea.vmem [#allocation4], %s1709_s13  ;;  %s2074_s12 = smov 16  }
  0x1c   : > { %1794 = vmatprep.subr.mxu1 %v2068_v1  ;;  %1815 = vmatpush3.msra.mxu0 %v346_v6  ;;  %s2075_s13 = smov 24   ;;  %s1598_s25 = sshll.u32 %s2299_s17, 4  ;;  %s2415_s25 = int_to_ptr.vmem [resolvable:$true] %s1598_s25 }
  0x1d   : > { %1795 = vmatpush3.msra.mxu1 %v337_v7  ;;  %1816 = vmatprep.subr.mxu0 %v2068_v1  ;;  %s1976_s20 = scalar_lea.vmem %s2415_s25, 512 }
  0x1e   : > { %1797 = vmatmul.mubr.msk.f32.vlgmr.msra.gmra.mxu1 %vm349_vm1, %v332_v8  ;;  %1799 = vmatprep.subr.mxu1 %v2068_v1  ;;  %p1977_p11 = scmp.ne.s32.totalorder %s2415_s25, %s1976_s20 }
  0x1f   : > { %1800 = vmatpush3.msra.mxu1 %v344_v9  ;;  %1807 = vmatprep.mubr.msk.f32.mxu1 %vm2069_vm0, %v2068_v1 }
  0x20   : > { %1801 = vmatprep.subr.mxu1 %v2068_v1  ;;  %1817 = vmatpush3.msra.mxu0 %v345_v10  ;;  %p1978_p12 = pnand %p1977_p11, %p2162_p5 }
  0x21   : > { %1802 = vmatpush3.msra.mxu1 %v343_v11  ;;  %1818 = vmatprep.mubr.msk.f32.mxu0 %vm2069_vm0, %v2068_v1 }
  0x22   : > { %1803 = vmatprep.subr.mxu1 %v2068_v1  ;;  %1819 = vmatmul.mubr.msk.f32.vlgmr.msra.gmra.mxu0 %vm349_vm1, %v2224_v12  ;;  %p1979_p13 = pneg %p1978_p12 }
  0x23   : > { %1804 = vmatpush3.msra.mxu1 %v342_v13  ;;  %1831 = vmatprep.subr.mxu0 %v2068_v1 }
  0x24   : > { %1805 = vmatprep.subr.mxu1 %v2068_v1  ;;  %1833 = vmatprep.mubr.msk.f32.mxu0 %vm2069_vm0, %v2068_v1 }
  0x25   : > { %1806 = vmatpush3.msra.mxu1 %v341_v14 }
  0x26   : > { %1808 = vmatmul.mubr.msk.f32.vlgmr.msra.gmra.mxu1 %vm349_vm1, %v333_v15  ;;  %1821 = vmatprep.subr.mxu1 %v2068_v1 }
  0x27   : > { %1823 = vmatprep.mubr.msk.f32.mxu1 %vm2069_vm0, %v2068_v1 }
  0xde   : > { %v2246_v16 = vpop.f32.mrf.mxu1 }
  0xe0   : > { %v1798_v17 = vpop.f32.mrf.mxu1 }
  0xe2   : > { %v565_v18 = vpop.f32.mrf.mxu0 }
  0xe4   : > { %v1820_v19 = vpop.f32.mrf.mxu0 }
  0xe6   : > { %v492_v20 = vpop.f32.mrf.mxu1 }
  0xe7   : > { %726 = vrot.lane.b32.xlu1 %v492_v20, %s2070_s22  ;;  %648 = vrot.lane.b32.xlu0 %v492_v20, %s2071_s23 }
  0xe8   : > { %1822 = vmatpush3.xpose.msk.msra.mxu1 %vm569_vm2, %v492_v20  ;;  %v1809_v21 = vpop.f32.mrf.mxu1 }
  0xe9   : > { %1826 = vmatprep.subr.mxu1 %v2068_v1 }
  0xeb   : > { %1824 = vmatmul.mubr.msk.f32.vlgmr.msra.gmra.mxu1 %vm569_vm2, %v565_v18  ;;  %804 = vrot.lane.b32.xlu1 %v492_v20, %s2072_s24 }
  0xec   : > { %646 = vrot.lane.b32.xlu0 %v565_v18, %s2071_s23  ;;  %1828 = vmatprep.mubr.msk.f32.mxu1 %vm2069_vm0, %v2068_v1 }
  0xef   : > { %802 = vrot.lane.b32.xlu1 %v565_v18, %s2072_s24 }
  0xf0   : > { %724 = vrot.lane.b32.xlu0 %v565_v18, %s2070_s22 }
 0x159   : > { %v727_v22 = vpop.permute.xlu1 %726  ;;  %v649_v23 = vpop.permute.xlu0 %648 }
 0x15a   : > { %1827 = vmatpush3.xpose.msk.msra.mxu1 %vm569_vm2, %v649_v23  ;;  %1832 = vmatpush3.xpose.msk.msra.mxu0 %vm569_vm2, %v727_v22 }
 0x15b   : > { %1836 = vmatprep.subr.mxu1 %v2068_v1  ;;  %1841 = vmatprep.subr.mxu0 %v2068_v1 }
 0x15d   : > { %v805_v24 = vpop.permute.xlu1 %804 }
 0x15e   : > { %v647_v25 = vpop.permute.xlu0 %646 }
 0x15f   : > { %1829 = vmatmul.mubr.msk.f32.vlgmr.msra.gmra.mxu1 %vm569_vm2, %v647_v25 }
 0x160   : > { %1837 = vmatpush3.xpose.msk.msra.mxu1 %vm569_vm2, %v805_v24  ;;  %1838 = vmatprep.mubr.msk.f32.mxu1 %vm2069_vm0, %v2068_v1 }
 0x161   : > { %v803_v26 = vpop.permute.xlu1 %802  ;;  %1846 = vmatprep.subr.mxu1 %v2068_v1 }
 0x162   : > { %v725_v27 = vpop.permute.xlu0 %724 }
 0x163   : > { %1834 = vmatmul.mubr.msk.f32.vlgmr.msra.gmra.mxu0 %vm569_vm2, %v725_v27  ;;  %1839 = vmatmul.mubr.msk.f32.vlgmr.msra.gmra.mxu1 %vm569_vm2, %v803_v26 }
 0x164   : > { %1842 = vmatpush3.msra.mxu0 %v2246_v16  ;;  %1843 = vmatprep.mubr.msk.f32.mxu0 %vm2069_vm0, %v2068_v1 }
 0x165   : > { %1851 = vmatprep.subr.mxu0 %v2068_v1  ;;  %1848 = vmatprep.mubr.msk.f32.mxu1 %vm2069_vm0, %v2068_v1 }
 0x1ab   : > { %v642_v29 = vpop.f32.mrf.mxu1 }
 0x1ac   : > { %v880_v30 = vadd.f32 %v642_v29, %v335_v28 }
 0x1ad   : > { %v1825_v31 = vpop.f32.mrf.mxu1 }
 0x1ae   : > { %v884_v32 = vsel %vm569_vm2, %v880_v30, -inf }
 0x1af   : > { %885 = vmax.xlane.f32.xlu0 %v884_v32 }
 0x21f   : > { %v720_v33 = vpop.f32.mrf.mxu1 }
 0x220   : > { %v881_v34 = vadd.f32 %v720_v33, %v335_v28 }
 0x221   : > { %v1830_v35 = vpop.f32.mrf.mxu1 }
 0x222   : > { %v887_v36 = vsel %vm569_vm2, %v881_v34, -inf }
 0x223   : > { %v798_v37 = vpop.f32.mrf.mxu0  ;;  %888 = vmax.xlane.f32.xlu1 %v887_v36  ;;  %v876_v38 = vpop.f32.mrf.mxu1  ;;  %v1270_v36 = vld [vmem:[%s2489_s3 + $0x18] sm:$0xff] }
 0x224   : > { %v882_v39 = vadd.f32 %v798_v37, %v335_v28  ;;  %v883_v42 = vadd.f32 %v876_v38, %v335_v28  ;;  %v1269_v37 = vld [vmem:[%s2489_s3 + $0x10] sm:$0xff]  ;;  %v1268_v38 = vld [vmem:[%s2489_s3 + $0x8] sm:$0xff] }
 0x225   : > { %v1835_v40 = vpop.f32.mrf.mxu0  ;;  %v1840_v41 = vpop.f32.mrf.mxu1 }
 0x226   : > { %v890_v43 = vsel %vm569_vm2, %v882_v39, -inf  ;;  %v893_v44 = vsel %vm569_vm2, %v883_v42, -inf }
 0x227   : > { %891 = vmax.xlane.f32.xlu0 %v890_v43 }
 0x22b   : > { %894 = vmax.xlane.f32.xlu0 %v893_v44 }
 0x238   : > { %v886_v45 = vpop.xlane.xlu0 %885 }
 0x239   : > { %v896_v46 = vsub.f32 %v880_v30, %v886_v45 }
 0x23b   : > { %v900_v47 = vmul.f32 1.442695, %v896_v46 }
 0x23d   : > { %1956 = vpow2.f32 %v900_v47 }
 0x24a   : > { %v1957_v48 = vpop.eup %1956 }
 0x24b   : > { %v908_v49 = vsel %vm569_vm2, %v1957_v48, 0.0 }
 0x24c   : > { %909 = vadd.xlane.f32.xlu1 %v908_v49 }
 0x2ac   : > { %v889_v50 = vpop.xlane.xlu1 %888 }
 0x2ad   : > { %v897_v51 = vsub.f32 %v881_v34, %v889_v50 }
 0x2af   : > { %v902_v52 = vmul.f32 1.442695, %v897_v51 }
 0x2b0   : > { %v892_v53 = vpop.xlane.xlu0 %891 }
 0x2b1   : > { %1958 = vpow2.f32 %v902_v52  ;;  %v898_v54 = vsub.f32 %v882_v39, %v892_v53  ;;  %v1267_v39 = vld [vmem:[%s2489_s3] sm:$0xff]  ;;  %v1271_v52 = vlaneseq }
 0x2b3   : > { %v904_v55 = vmul.f32 1.442695, %v898_v54  ;;  %v2344_v53 = vshrl.u32 %v1271_v52, 7 }
 0x2b4   : > { %v895_v56 = vpop.xlane.xlu0 %894 }
 0x2b5   : > { %1960 = vpow2.f32 %v904_v55  ;;  %v899_v57 = vsub.f32 %v883_v42, %v895_v56  ;;  %v1273_v54 = vsub.s32 0, %v2344_v53  ;;  %v2350_v55 = vld [vmem:[%s2492_s6] sm:$0xff] }
 0x2b7   : > { %v906_v58 = vmul.f32 1.442695, %v899_v57  ;;  %v1274_v56 = vrot.slane %v2350_v55, %v1273_v54 }
 0x2b9   : > { %1962 = vpow2.f32 %v906_v58 }
 0x2be   : > { %v1959_v59 = vpop.eup %1958 }
 0x2bf   : > { %v911_v60 = vsel %vm569_vm2, %v1959_v59, 0.0 }
 0x2c0   : > { %912 = vadd.xlane.f32.xlu0 %v911_v60 }
 0x2c2   : > { %v1961_v61 = vpop.eup %1960 }
 0x2c3   : > { %v914_v62 = vsel %vm569_vm2, %v1961_v61, 0.0 }
 0x2c4   : > { %915 = vadd.xlane.f32.xlu1 %v914_v62 }
 0x2c6   : > { %v1963_v63 = vpop.eup %1962 }
 0x2c7   : > { %v917_v0 = vsel %vm569_vm2, %v1963_v63, 0.0 }
 0x2c8   : > { %918 = vadd.xlane.f32.xlu0 %v917_v0 }
 0x2d5   : > { %1022 = vrot.lane.b32.xlu1 %v2246_v16, %s2071_s23  ;;  %v910_v2 = vpop.xlane.xlu1 %909 }
 0x2d6   : > { %v920_v3 = vmax.f32 %v910_v2, 1e-30 }
 0x2d8   : > { %1964 = vrcp.f32 %v920_v3 }
 0x2d9   : > { %1174 = vrot.lane.b32.xlu1 %v2246_v16, %s2072_s24 }
 0x2de   : > { %1098 = vrot.lane.b32.xlu0 %v2246_v16, %s2070_s22  ;;  %s2076_s22 = smov [#allocation4]  }
 0x2df   : > { %s1980_s23 = sshll.u32 %s2076_s22, 4  ;;  %s1981_s23 = int_to_ptr.vmem [resolvable:$false] %s1980_s23 }
 0x2e0   : > { %p1983_p0 = scmp.lt.s32.totalorder %s2415_s25, %s1981_s23 }
 0x2e5   : > { %v1965_v4 = vpop.eup %1964 }
 0x2e6   : > { %v928_v5 = vmul.f32 %v1965_v4, %v920_v3 }
 0x2e8   : > { %v932_v6 = vsub.f32 2.0, %v928_v5  ;;  %v1375_v5 = vld [vmem:[%s2490_s4 + $0x10] sm:$0xff] }
 0x2ea   : > { %v936_v7 = vmul.f32 %v1965_v4, %v932_v6  ;;  %v1376_v4 = vld [vmem:[%s2490_s4 + $0x18] sm:$0xff]  ;;  %v1373_v6 = vld [vmem:[%s2490_s4] sm:$0xff] }
 0x2ec   : > { %v940_v8 = vmul.f32 %v1957_v48, %v936_v7  ;;  %v1462_v7 = vld [vmem:[%s2491_s5 + $0x38] sm:$0xff] }
 0x2ee   : > { %1844 = vmatmul.mubr.msk.f32.vlgmr.msra.gmra.mxu0 %vm569_vm2, %v940_v8  ;;  %944 = vst.msk [vmem:[%s2299_s17] sm:$0xff] %vm569_vm2, %v940_v8  ;;  %v1461_v8 = vld [vmem:[%s2491_s5 + $0x30] sm:$0xff] }
 0x2ef   : > { %1853 = vmatprep.mubr.msk.f32.mxu0 %vm2069_vm0, %v2068_v1 }
 0x349   : > { %v913_v9 = vpop.xlane.xlu0 %912 }
 0x34a   : > { %v921_v10 = vmax.f32 %v913_v9, 1e-30  ;;  %v1460_v9 = vld [vmem:[%s2491_s5 + $0x28] sm:$0xff] }
 0x34c   : > { %1966 = vrcp.f32 %v921_v10 }
 0x34d   : > { %v916_v11 = vpop.xlane.xlu1 %915 }
 0x34e   : > { %v922_v13 = vmax.f32 %v916_v11, 1e-30  ;;  %v1458_v11 = vld [vmem:[%s2491_s5 + $0x18] sm:$0xff] }
 0x350   : > { %1968 = vrcp.f32 %v922_v13 }
 0x351   : > { %v1023_v14 = vpop.permute.xlu1 %1022  ;;  %v919_v15 = vpop.xlane.xlu0 %918 }
 0x352   : > { %v923_v16 = vmax.f32 %v919_v15, 1e-30  ;;  %1847 = vmatpush3.msra.mxu1 %v1023_v14 }
 0x353   : > { %1856 = vmatprep.subr.mxu1 %v2068_v1 }
 0x354   : > { %1970 = vrcp.f32 %v923_v16 }
 0x355   : > { %v1099_v17 = vpop.permute.xlu0 %1098  ;;  %v1175_v29 = vpop.permute.xlu1 %1174 }
 0x356   : > { %1852 = vmatpush3.msra.mxu0 %v1099_v17  ;;  %v1370_v17 = vsub.s32 2, %v2344_v53 }
 0x357   : > { %1861 = vmatprep.subr.mxu0 %v2068_v1 }
 0x359   : > { %v1967_v18 = vpop.eup %1966 }
 0x35a   : > { %v929_v19 = vmul.f32 %v1967_v18, %v921_v10  ;;  %v1459_v10 = vld [vmem:[%s2491_s5 + $0x20] sm:$0xff] }
 0x35c   : > { %v933_v20 = vsub.f32 2.0, %v929_v19 }
 0x35d   : > { %v1969_v21 = vpop.eup %1968 }
 0x35e   : > { %v937_v22 = vmul.f32 %v1967_v18, %v933_v20  ;;  %v930_v23 = vmul.f32 %v1969_v21, %v922_v13 }
 0x360   : > { %v941_v24 = vmul.f32 %v1959_v59, %v937_v22  ;;  %v934_v25 = vsub.f32 2.0, %v930_v23 }
 0x361   : > { %v1971_v26 = vpop.eup %1970 }
 0x362   : > { %v938_v27 = vmul.f32 %v1969_v21, %v934_v25  ;;  %v931_v28 = vmul.f32 %v1971_v26, %v923_v16  ;;  %1849 = vmatmul.mubr.msk.f32.vlgmr.msra.gmra.mxu1 %vm569_vm2, %v941_v24  ;;  %945 = vst.msk [vmem:[%s2299_s17 + $0x8] sm:$0xff] %vm569_vm2, %v941_v24  ;;  %v1365_v16 = vsub.s32 1, %v2344_v53  ;;  %v1371_v21 = vrot.slane %v2350_v55, %v1370_v17  ;;  %v1457_v24 = vld [vmem:[%s2491_s5 + $0x10] sm:$0xff]  ;;  %v1456_v25 = vld [vmem:[%s2491_s5 + $0x8] sm:$0xff] }
 0x363   : > { %1857 = vmatpush3.msra.mxu1 %v1175_v29  ;;  %1858 = vmatprep.mubr.msk.f32.mxu1 %vm2069_vm0, %v2068_v1 }
 0x364   : > { %v942_v30 = vmul.f32 %v1961_v61, %v938_v27  ;;  %v935_v31 = vsub.f32 2.0, %v931_v28  ;;  %1872 = vmatprep.subr.mxu1 %v2068_v1  ;;  %v1366_v18 = vrot.slane %v2350_v55, %v1365_v16  ;;  %v1379_v27 = vsub.s32 3, %v2344_v53 }
 0x366   : > { %v939_v32 = vmul.f32 %v1971_v26, %v935_v31  ;;  %1854 = vmatmul.mubr.msk.f32.vlgmr.msra.gmra.mxu0 %vm569_vm2, %v942_v30  ;;  %946 = vst.msk [vmem:[%s2299_s17 + $0x10] sm:$0xff] %vm569_vm2, %v942_v30  ;;  %v1455_v26 = vld [vmem:[%s2491_s5] sm:$0xff]  ;;  %v1380_v28 = vrot.slane %v2350_v55, %v1379_v27 }
 0x367   : > { %1869 = vmatprep.mubr.msk.f32.mxu0 %vm2069_vm0, %v2068_v1  ;;  %1862 = vmatpush3.msra.mxu0 %v1270_v36 }
 0x368   : > { %v943_v33 = vmul.f32 %v1963_v63, %v939_v32  ;;  %1863 = vmatprep.subr.mxu0 %v2068_v1 }
 0x369   : > { %1864 = vmatpush3.msra.mxu0 %v1269_v37 }
 0x36a   : > { %1859 = vmatmul.mubr.msk.f32.vlgmr.msra.gmra.mxu1 %vm569_vm2, %v943_v33  ;;  %947 = vst.msk [vmem:[%s2299_s17 + $0x18] sm:$0xff] %vm569_vm2, %v943_v33  ;;  %1865 = vmatprep.subr.mxu0 %v2068_v1  ;;  %v1465_v33 = vsub.s32 4, %v2344_v53  ;;  %s1982_s17 = scalar_lea.vmem %s1981_s23, 1024 }
 0x36b   : > { %1880 = vmatprep.mubr.msk.f32.mxu1 %vm2069_vm0, %v2068_v1  ;;  %1866 = vmatpush3.msra.mxu0 %v1268_v38  ;;  %p1984_p1 = scmp.lt.s32.totalorder %s1982_s17, %s1976_s20 }
 0x36c   : > { %1867 = vmatprep.subr.mxu0 %v2068_v1  ;;  %1873 = vmatpush3.msra.mxu1 %v1376_v4 }
 0x36d   : > { %1868 = vmatpush3.msra.mxu0 %v1267_v39  ;;  %1874 = vmatprep.subr.mxu1 %v2068_v1  ;;  %p1985_p2 = por %p1984_p1, %p1983_p0 }
 0x36e   : > { %1883 = vmatprep.subr.mxu0 %v2068_v1  ;;  %1875 = vmatpush3.msra.mxu1 %v1375_v5 }
 0x36f   : > { %1876 = vmatprep.subr.mxu1 %v2068_v1  ;;  %p1986_p3 = pnand %p1985_p2, %p1979_p13 }
 0x3ae   : > { %v1017_v34 = vpop.f32.mrf.mxu0 }
 0x3b0   : > { %v1845_v35 = vpop.f32.mrf.mxu0 }
 0x422   : > { %v1094_v40 = vpop.f32.mrf.mxu1 }
 0x423   : > { %1251 = vrot.lane.b32.xlu1 %v1094_v40, %s2073_s10 }
 0x424   : > { %v1850_v41 = vpop.f32.mrf.mxu1 }
 0x426   : > { %v1170_v42 = vpop.f32.mrf.mxu0 }
 0x427   : > { %1255 = vrot.lane.b32.xlu0 %v1170_v42, %s2074_s12 }
 0x428   : > { %v1855_v43 = vpop.f32.mrf.mxu0 }
 0x42a   : > { %v1246_v44 = vpop.f32.mrf.mxu1 }
 0x42b   : > { %1259 = vrot.lane.b32.xlu1 %v1246_v44, %s2075_s13 }
 0x42c   : > { %v1860_v45 = vpop.f32.mrf.mxu1 }
 0x495   : > { %v1252_v46 = vpop.permute.xlu1 %1251 }
 0x496   : > { %v1262_v48 = vsel %vm569_vm2, %v1017_v34, %v1252_v46  ;;  %v1466_v34 = vrot.slane %v2350_v55, %v1465_v33 }
 0x499   : > { %v1256_v47 = vpop.permute.xlu0 %1255 }
 0x49a   : > { %v1264_v49 = vsel %vm1263_vm3, %v1262_v48, %v1256_v47 }
 0x49d   : > { %v1260_v50 = vpop.permute.xlu1 %1259 }
 0x49e   : > { %v1266_v51 = vsel %vm1265_vm4, %v1264_v49, %v1260_v50 }
 0x49f   : > { %1870 = vmatmul.mubr.msk.f32.vlgmr.msra.gmra.mxu0 %vm349_vm1, %v1266_v51 }
 0x4a0   : > { %1899 = vmatprep.mubr.msk.f32.mxu0 %vm2069_vm0, %v2068_v1  ;;  %1884 = vmatpush3.msra.mxu0 %v1462_v7 }
 0x4a1   : > { %1885 = vmatprep.subr.mxu0 %v2068_v1 }
 0x4a2   : > { %1886 = vmatpush3.msra.mxu0 %v1461_v8 }
 0x4a3   : > { %1887 = vmatprep.subr.mxu0 %v2068_v1 }
 0x4a4   : > { %1888 = vmatpush3.msra.mxu0 %v1460_v9 }
 0x4a5   : > { %1889 = vmatprep.subr.mxu0 %v2068_v1 }
 0x4a6   : > { %1890 = vmatpush3.msra.mxu0 %v1459_v10 }
 0x4a7   : > { %1891 = vmatprep.subr.mxu0 %v2068_v1 }
 0x4a8   : > { %1892 = vmatpush3.msra.mxu0 %v1458_v11 }
 0x4a9   : > { %1893 = vmatprep.subr.mxu0 %v2068_v1 }
 0x4aa   : > { %1894 = vmatpush3.msra.mxu0 %v1457_v24 }
 0x4ab   : > { %1895 = vmatprep.subr.mxu0 %v2068_v1 }
 0x4ac   : > { %1896 = vmatpush3.msra.mxu0 %v1456_v25 }
 0x4ad   : > { %1897 = vmatprep.subr.mxu0 %v2068_v1 }
 0x4ae   : > { %1898 = vmatpush3.msra.mxu0 %v1455_v26 }
 0x55f   : > { %v1344_v57 = vpop.f32.mrf.mxu0 }
 0x560   : > { %v1345_v58 = vadd.f32 %v1344_v57, %v1274_v56 }
 0x561   : > { %v1871_v59 = vpop.f32.mrf.mxu0 }
 0x562   : > { %v1348_v60 = vadd.f32 %v1345_v58, %v2224_v12  ;;  %v1374_v12 = vld [vmem:[%s2490_s4 + $0x8] sm:$0xff] }
 0x563   : > { %1877 = vmatpush3.msra.mxu1 %v1374_v12 }
 0x564   : > { %v1349_v61 = vsel %vm349_vm1, %v1348_v60, 0.0  ;;  %1878 = vmatprep.subr.mxu1 %v2068_v1 }
 0x565   : > { %1350 = vadd.xlane.f32.xlu0 %v1349_v61  ;;  %1879 = vmatpush3.msra.mxu1 %v1373_v6 }
 0x5ee   : > { %v1351_v62 = vpop.xlane.xlu0 %1350 }
 0x5ef   : > { %v1353_v63 = vmul.f32 0.03125, %v1351_v62 }
 0x5f1   : > { %v1354_v0 = vsub.f32 %v1348_v60, %v1353_v63 }
 0x5f3   : > { %v1355_v2 = vmul.f32 %v1354_v0, %v1354_v0 }
 0x5f5   : > { %v1356_v3 = vsel %vm349_vm1, %v1355_v2, 0.0 }
 0x5f6   : > { %1357 = vadd.xlane.f32.xlu1 %v1356_v3 }
 0x67f   : > { %v1358_v13 = vpop.xlane.xlu1 %1357 }
 0x680   : > { %v1359_v14 = vmul.f32 0.03125, %v1358_v13 }
 0x682   : > { %v1360_v15 = vadd.f32 1e-05, %v1359_v14 }
 0x684   : > { %1972 = vrsqrt.f32 %v1360_v15 }
 0x691   : > { %v1973_v19 = vpop.eup %1972 }
 0x692   : > { %v1362_v20 = vmul.f32 %v1973_v19, %v1354_v0 }
 0x694   : > { %v1367_v22 = vmul.f32 %v1366_v18, %v1362_v20 }
 0x696   : > { %v1372_v23 = vadd.f32 %v1371_v21, %v1367_v22 }
 0x698   : > { %1881 = vmatmul.mubr.msk.f32.vlgmr.msra.gmra.mxu1 %vm349_vm1, %v1372_v23 }
 0x758   : > { %v1450_v29 = vpop.f32.mrf.mxu1 }
 0x759   : > { %v1451_v30 = vadd.f32 %v1450_v29, %v1380_v28 }
 0x75a   : > { %v1882_v31 = vpop.f32.mrf.mxu1 }
 0x75b   : > { %v1454_v32 = vmax.f32 %v1451_v30, 0.0 }
 0x75d   : > { %1900 = vmatmul.mubr.msk.f32.vlgmr.msra.gmra.mxu0 %vm1467_vm5, %v1454_v32 }
 0x81d   : > { %v1537_v35 = vpop.f32.mrf.mxu0 }
 0x81e   : > { %v1538_v1 = vadd.f32 %v1537_v35, %v1466_v34 }
 0x81f   : > { %v1901_v36 = vpop.f32.mrf.mxu0 }
 0x820   : > { %v1541_v37 = vadd.f32 %v1538_v1, %v1372_v23 }
 0x822   : > { %v1542_v38 = vsel %vm349_vm1, %v1541_v37, 0.0 }
 0x823   : > { %1543 = vadd.xlane.f32.xlu0 %v1542_v38 }
 0x8ac   : > { %v1544_v39 = vpop.xlane.xlu0 %1543 }
 0x8ad   : > { %v1545_v40 = vmul.f32 0.03125, %v1544_v39 }
 0x8af   : > { %v1546_v41 = vsub.f32 %v1541_v37, %v1545_v40 }
 0x8b1   : > { %v1547_v42 = vmul.f32 %v1546_v41, %v1546_v41 }
 0x8b3   : > { %v1548_v43 = vsel %vm349_vm1, %v1547_v42, 0.0 }
 0x8b4   : > { %1549 = vadd.xlane.f32.xlu0 %v1548_v43 }
 0x8b5   : > { %1989 = shalt.err (!%p1986_p3)
}
 0x8b6   : > { %s1990_s24 = scalar_lea.hbm %s2420_s18, 512  ;;  %s1994_s13 = scalar_lea.hbm %s2494_s8, 1024 }
 0x8b7   : > { %p1991_p4 = scmp.ne.s32.totalorder %s2420_s18, %s1990_s24  ;;  %p1995_p9 = scmp.lt.s32.totalorder %s2420_s18, %s2494_s8 }
 0x8b8   : > { %p1996_p10 = scmp.lt.s32.totalorder %s1994_s13, %s1990_s24 }
 0x8b9   : > { %p1992_p7 = pnand %p1991_p4, %p2162_p5 }
 0x8ba   : > { %p1997_p11 = por %p1996_p10, %p1995_p9 }
 0x8bb   : > { %p1993_p8 = pneg %p1992_p7 }
 0x8bd   : > { %p1998_p12 = pnand %p1997_p11, %p1993_p8 }
 0x8bf   : > { %2001 = shalt.err (!%p1998_p12)
}
 0x8c0   : > { %s2077_s20 = smov 128   ;;  %s2497_s23 = scalar_lea.sflag [#allocation5], %s2295_s21  ;;  %v1557_v47 = vsub.s32 5, %v2344_v53  ;;  %v1562_v48 = vsub.s32 6, %v2344_v53 }
 0x8c1   : > { %1904 = dma.vmem_to_hbm [thread:$0]  (%p2162_p5), %s2415_s25, 512, %s2420_s18, %s2497_s23, %s2077_s20, %s2077_s20, %s2073_s10  }
 0x8c2   : > { %s1708_s19 = sshll.u32 %s2295_s21, 3  ;;  %v1558_v49 = vrot.slane %v2350_v55, %v1557_v47  ;;  %v1563_v52 = vrot.slane %v2350_v55, %v1562_v48  ;;  %s1732_s17 = sshll.u32 %s2145_s9, 7 }
 0x8c3   : > { %s315_s24 = scalar_lea.vmem [#allocation2], %s1708_s19  ;;  %s1583_s26 = scalar_lea.hbm %s2493_s7, %s1732_s17 }
 0x8c4   : > { %s1585_s10 = sshll.u32 %s315_s24, 4  ;;  %s1567_s12 = scalar_lea.sflag [#allocation3], %s2295_s21  ;;  %s1586_s10 = int_to_ptr.vmem [resolvable:$true] %s1585_s10 }
 0x8c5   : > { %s2002_s13 = scalar_lea.vmem %s1586_s10, 128  ;;  %s2078_s22 = smov [#allocation2]  }
 0x8c6   : > { %p2003_p13 = scmp.ne.s32.totalorder %s1586_s10, %s2002_s13  ;;  %s2006_s20 = sshll.u32 %s2078_s22, 4  ;;  %s2007_s20 = int_to_ptr.vmem [resolvable:$false] %s2006_s20 }
 0x8c7   : > { %s2008_s9 = scalar_lea.vmem %s2007_s20, 256  ;;  %p2009_p2 = scmp.lt.s32.totalorder %s1586_s10, %s2007_s20 }
 0x8c8   : > { %p2004_p0 = pnand %p2003_p13, %p2162_p5  ;;  %p2010_p3 = scmp.lt.s32.totalorder %s2008_s9, %s2002_s13 }
 0x8ca   : > { %p2005_p1 = pneg %p2004_p0  ;;  %p2011_p4 = por %p2010_p3, %p2009_p2 }
 0x8cc   : > { %p2012_p7 = pnand %p2011_p4, %p2005_p1 }
 0x93d   : > { %v1550_v44 = vpop.xlane.xlu0 %1549 }
 0x93e   : > { %v1551_v45 = vmul.f32 0.03125, %v1550_v44 }
 0x940   : > { %v1552_v46 = vadd.f32 1e-05, %v1551_v45 }
 0x942   : > { %1974 = vrsqrt.f32 %v1552_v46 }
 0x94f   : > { %v1975_v50 = vpop.eup %1974 }
 0x950   : > { %v1554_v51 = vmul.f32 %v1975_v50, %v1546_v41 }
 0x952   : > { %v1559_v54 = vmul.f32 %v1558_v49, %v1554_v51 }
 0x954   : > { %v1564_v56 = vadd.f32 %v1563_v52, %v1559_v54 }
 0x956   : > { %1565 = vst.msk [vmem:[%s315_s24] sm:$0xff] %vm349_vm1, %v1564_v56 }
 0x957   : > { %2015 = shalt.err (!%p2012_p7)
}
 0x958   : > { %s2016_s23 = scalar_lea.hbm %s1583_s26, 128  ;;  %s2020_s17 = scalar_lea.hbm %s2493_s7, 256 }
 0x959   : > { %p2017_p8 = scmp.ne.s32.totalorder %s1583_s26, %s2016_s23  ;;  %p2021_p11 = scmp.lt.s32.totalorder %s1583_s26, %s2493_s7 }
 0x95a   : > { %p2022_p12 = scmp.lt.s32.totalorder %s2020_s17, %s2016_s23 }
 0x95b   : > { %p2018_p9 = pnand %p2017_p8, %p2162_p5 }
 0x95c   : > { %p2023_p13 = por %p2022_p12, %p2021_p11 }
 0x95d   : > { %p2019_p10 = pneg %p2018_p9 }
 0x95f   : > { %p2024_p0 = pnand %p2023_p13, %p2019_p10 }
 0x961   : > { %2027 = shalt.err (!%p2024_p0)
}
 0x962   : > { %1903 = dma.vmem_to_hbm [thread:$0]  (%p2162_p5), %s1586_s10, 128, %s1583_s26, %s1567_s12  }
 0x963 PF: > { %p1914_p1 = scmp.ge.s32.totalorder %s2066_s30, 2  ;;  %s1613_s18 = sand.u32 1, %s2054_s27  }
 0x964   : > { %s1614_s13 = scalar_lea.sflag [#allocation3], %s1613_s18 }
 0x965   : > { %p1908_p2 = pnand %p1914_p1, %p2166_p6 }
 0x967   : > { %p1909_p3 = pneg %p1908_p2 }
 0x969   : > { %2045 = dma.done.wait (%p1909_p3), %s1614_s13, 128  }
 0x96a   : > { %2047 = vsyncadd (%p1909_p3), %s1614_s13, 4294967168  ;;  %s1623_s22 = scalar_lea.sflag [#allocation5], %s1613_s18 }
 0x96b   : > { %2049 = dma.done.wait (%p1909_p3), %s1623_s22, 512  }
 0x96c   : > { %2051 = vsyncadd (%p1909_p3), %s1623_s22, 4294966784  ;;  %p22_p5 = scmp.ge.s32.totalorder %s2149_s11, 4   ;;  %s2498_s27 = smov %s2058_s28 }
 0x96d   : > { %s2499_s28 = smov %s2062_s29  ;;  %s2500_s29 = smov %s2160_s14 }
 0x96e   : > { %s2501_s30 = smov %s2149_s11  ;;  %24 = sbr.rel (!%p22_p5) target bundleno = 5 (0x5), region = 103 }
 0x973   :  { %1628 = vsyncpa [#allocation3], 1 }
 0x974   :  { %1630 = vsyncpa [#allocation3 + $0x1], 1 }
 0x975   :  { %1631 = vsyncpa [#allocation5], 1 }
 0x976   :  { %1633 = vsyncpa [#allocation5 + $0x1], 1 }

</bundles_post_ra>
